<compile_context>
chip_gen: v6e
topology: v6e:2x2x1
jax: 0.10.0
libtpu: 0.0.40
codegen_flags: <defaults>
</compile_context>

<pallas_src>
import functools

import jax
import jax.numpy as jnp
from jax import lax
from jax.experimental import pallas as pl
from jax.experimental.pallas import tpu as pltpu

_NEG_BIG = -1e30  # large finite "masked" logit (NOT -inf: keeps exp NaN-free)


def _round_up(x, m):
    return (x + m - 1) // m * m


# ---------------------------------------------------------------------------
# Online-softmax state helpers (flash-attention style).
# ---------------------------------------------------------------------------
def _init_state(m_sc, l_sc, psum_sc, cnt_sc):
    @pl.when(pl.program_id(1) == 0)
    def _():
        m_sc[...] = jnp.full_like(m_sc, -jnp.inf)
        l_sc[...] = jnp.zeros_like(l_sc)
        psum_sc[...] = jnp.zeros_like(psum_sc)
        cnt_sc[...] = jnp.zeros_like(cnt_sc)


def _tile_update(s_keep, psum_t, cnt_t, m_new, alpha, l_prev,
                 l_sc, psum_sc, cnt_sc):
    p = jnp.exp(s_keep - m_new)              # masked entries underflow to 0
    l_sc[...] = alpha * l_prev + jnp.sum(p, axis=1, keepdims=True)
    psum_sc[...] += psum_t
    cnt_sc[...] += cnt_t


def _finalize(out_ref, m_sc, l_sc, psum_sc, cnt_sc, neg_scale):
    @pl.when(pl.program_id(1) == pl.num_programs(1) - 1)
    def _():
        cnt = cnt_sc[...]
        log_denom = m_sc[...] + jnp.log(l_sc[...])
        # Rows with zero positives give 0/0 = NaN (as in PyTorch); padded rows
        # are sliced off in the wrapper before the final mean.
        out_ref[...] = neg_scale * ((psum_sc[...] - cnt * log_denom) / cnt)


def _keep_mask(i, j, tm, tn, n_valid, mask_cols):
    # Small (tm,1)/(1,tn) iotas; the compares broadcast over the tile.
    r = i * tm + lax.broadcasted_iota(jnp.int32, (tm, 1), 0)
    c = j * tn + lax.broadcasted_iota(jnp.int32, (1, tn), 1)
    keep = r != c                                  # logits_mask (exclude self)
    if mask_cols:
        keep = jnp.logical_and(keep, c < n_valid)  # drop padded contrast cols
    return keep


def _needs_mask(i, j, tm, tn, mask_cols):
    # Does this tile intersect the self-exclusion diagonal / padded columns?
    hit_diag = jnp.logical_and(i * tm < (j + 1) * tn, j * tn < (i + 1) * tm)
    if mask_cols:
        return jnp.logical_or(hit_diag, j == pl.num_programs(1) - 1)
    return hit_diag


# ---------------------------------------------------------------------------
# Kernel variant 1: positives mask built in-kernel from label vectors.
# ---------------------------------------------------------------------------
def _supcon_labels_kernel(a_ref, ct_ref, la_ref, lc_ref, out_ref,
                          m_sc, l_sc, psum_sc, cnt_sc, *,
                          neg_scale, tm, tn, n_valid, mask_cols):
    i = pl.program_id(0)
    j = pl.program_id(1)

    # (TM, D) bf16 x (D, TN) bf16 -> (TM, TN) f32 on the MXU (1/T pre-folded).
    s = jnp.dot(a_ref[...], ct_ref[...], preferred_element_type=jnp.float32)
    same = la_ref[...] == lc_ref[...]              # (TM,1)==(1,TN) -> (TM,TN)

    _init_state(m_sc, l_sc, psum_sc, cnt_sc)
    m_prev = m_sc[...]
    m_new = jnp.maximum(m_prev, jnp.max(s, axis=1, keepdims=True))  # raw max
    alpha = jnp.exp(m_prev - m_new)
    m_sc[...] = m_new
    l_prev = l_sc[...]

    needs = _needs_mask(i, j, tm, tn, mask_cols)

    @pl.when(needs)                                # diagonal / padded-col tile
    def _():
        keep = _keep_mask(i, j, tm, tn, n_valid, mask_cols)
        pos = jnp.logical_and(same, keep)
        _tile_update(jnp.where(keep, s, _NEG_BIG),
                     jnp.sum(jnp.where(pos, s, 0.0), axis=1, keepdims=True),
                     jnp.sum(pos.astype(jnp.float32), axis=1, keepdims=True),
                     m_new, alpha, l_prev, l_sc, psum_sc, cnt_sc)

    @pl.when(jnp.logical_not(needs))               # no masked entries here
    def _():
        _tile_update(s,
                     jnp.sum(jnp.where(same, s, 0.0), axis=1, keepdims=True),
                     jnp.sum(same.astype(jnp.float32), axis=1, keepdims=True),
                     m_new, alpha, l_prev, l_sc, psum_sc, cnt_sc)

    _finalize(out_ref, m_sc, l_sc, psum_sc, cnt_sc, neg_scale)


# ---------------------------------------------------------------------------
# Kernel variant 2: explicit user mask streamed as (TM, TN) bf16 tiles.
# ---------------------------------------------------------------------------
def _supcon_mask_kernel(a_ref, ct_ref, mask_ref, out_ref,
                        m_sc, l_sc, psum_sc, cnt_sc, *,
                        neg_scale, tm, tn, n_valid, mask_cols):
    i = pl.program_id(0)
    j = pl.program_id(1)

    s = jnp.dot(a_ref[...], ct_ref[...], preferred_element_type=jnp.float32)
    w = mask_ref[...].astype(jnp.float32)          # user mask as f32 weights

    _init_state(m_sc, l_sc, psum_sc, cnt_sc)
    m_prev = m_sc[...]
    m_new = jnp.maximum(m_prev, jnp.max(s, axis=1, keepdims=True))
    alpha = jnp.exp(m_prev - m_new)
    m_sc[...] = m_new
    l_prev = l_sc[...]

    needs = _needs_mask(i, j, tm, tn, mask_cols)

    @pl.when(needs)
    def _():
        keep = _keep_mask(i, j, tm, tn, n_valid, mask_cols)
        wk = jnp.where(keep, w, 0.0)
        _tile_update(jnp.where(keep, s, _NEG_BIG),
                     jnp.sum(wk * s, axis=1, keepdims=True),
                     jnp.sum(wk, axis=1, keepdims=True),
                     m_new, alpha, l_prev, l_sc, psum_sc, cnt_sc)

    @pl.when(jnp.logical_not(needs))
    def _():
        _tile_update(s,
                     jnp.sum(w * s, axis=1, keepdims=True),
                     jnp.sum(w, axis=1, keepdims=True),
                     m_new, alpha, l_prev, l_sc, psum_sc, cnt_sc)

    _finalize(out_ref, m_sc, l_sc, psum_sc, cnt_sc, neg_scale)


# ---------------------------------------------------------------------------
# Wrapper: faithful port of SupConLoss.forward.
# ---------------------------------------------------------------------------
def _vmem_budget_bytes():
    phys = 64 * 2 ** 20                  # conservative fallback (v7x per-TC)
    try:
        info = pltpu.get_tpu_info()
        phys = int(getattr(info, "vmem_capacity_bytes", phys)) or phys
    except Exception:
        pass
    return (phys * 3) // 4               # ~25% headroom for Mosaic scratch


def supcon_loss(features, labels=None, mask=None, *,
                temperature=0.07, contrast_mode='all', base_temperature=0.07,
                compute_dtype=jnp.bfloat16, block_m=512, block_n=1024):
    features = jnp.asarray(features)
    if features.ndim < 3:
        raise ValueError('`features` needs to be [bsz, n_views, ...]')
    if features.ndim > 3:
        features = features.reshape(features.shape[0], features.shape[1], -1)
    bsz, n_views, dim = features.shape

    if labels is not None and mask is not None:
        raise ValueError('Cannot define both `labels` and `mask`')

    contrast_count = n_views
    # torch.cat(torch.unbind(features, 1), 0): view-major stacking.
    contrast_feature = jnp.transpose(features, (1, 0, 2)).reshape(
        n_views * bsz, dim)
    if contrast_mode == 'one':
        anchor_feature = features[:, 0]
        anchor_count = 1
    elif contrast_mode == 'all':
        anchor_feature = contrast_feature
        anchor_count = contrast_count
    else:
        raise ValueError('Unknown mode: {}'.format(contrast_mode))

    M = bsz * anchor_count            # anchor rows
    N = bsz * contrast_count          # contrast columns
    d_pad = _round_up(dim, 128)       # clean MXU / DMA tiling along K
    isz = jnp.dtype(compute_dtype).itemsize
    mask_mode = mask is not None

    # --- tile selection ------------------------------------------------------
    M_r8 = _round_up(M, 8)
    N_r128 = _round_up(N, 128)
    tm = min(_round_up(int(block_m), 8), M_r8)
    tn = min(_round_up(int(block_n), 128), N_r128)
    # Keep >=2 M-tiles when possible so the "parallel" axis can shard across
    # both TensorCores on v7x (negligible cost on single-TC v5e/v6e).
    if tm >= M_r8 and M_r8 >= 16:
        tm = _round_up((M_r8 + 1) // 2, 8)

    def vmem_need(tm_, tn_):
        extra = (tm_ * tn_ * 2) if mask_mode else (tm_ * 4 + tn_ * 4)
        blocks = tm_ * d_pad * isz + d_pad * tn_ * isz + extra
        # double-buffered input blocks + f32 (tm,tn) temporaries + accumulators
        return 2 * blocks + 6 * tm_ * tn_ * 4 + 6 * tm_ * 4

    budget = _vmem_budget_bytes()
    while vmem_need(tm, tn) > budget and (tm > 8 or tn > 128):
        if tn > 128 and (tn >= tm or tm <= 8):
            tn = max(128, _round_up(tn // 2, 128))
        else:
            tm = max(8, _round_up(tm // 2, 8))

    m_pad = _round_up(M, tm)
    n_pad = _round_up(N, tn)
    grid = (m_pad // tm, n_pad // tn)
    mask_cols = n_pad != N
    vmem_limit = int(min(budget, max(2 * vmem_need(tm, tn), 32 * 2 ** 20)))

    # --- operands --------------------------------------------------------
    inv_temp = 1.0 / float(temperature)
    neg_scale = -(float(temperature) / float(base_temperature))
    # Fold 1/T into the cheap M*D anchor cast instead of a per-tile multiply.
    a = jnp.pad((anchor_feature * inv_temp).astype(compute_dtype),
                ((0, m_pad - M), (0, d_pad - dim)))
    ct = jnp.pad(jnp.transpose(contrast_feature.astype(compute_dtype)),
                 ((0, d_pad - dim), (0, n_pad - N)))   # (D, N) pre-transposed

    common = dict(neg_scale=neg_scale, tm=tm, tn=tn, n_valid=N,
                  mask_cols=mask_cols)
    a_spec = pl.BlockSpec((tm, d_pad), lambda i, j: (i, 0))
    ct_spec = pl.BlockSpec((d_pad, tn), lambda i, j: (0, j))
    out_spec = pl.BlockSpec((tm, 1), lambda i, j: (i, 0))
    out_shape = jax.ShapeDtypeStruct((m_pad, 1), jnp.float32)
    scratch = [pltpu.VMEM((tm, 1), jnp.float32) for _ in range(4)]

    if not mask_mode:
        if labels is None:
            lab = jnp.arange(bsz, dtype=jnp.int32)   # eye mask == self-label
        else:
            lab = jnp.asarray(labels).reshape(-1).astype(jnp.int32)
            if lab.shape[0] != bsz:
                raise ValueError('Num of labels does not match num of features')
        anchor_lab = jnp.tile(lab, anchor_count)
        contrast_lab = jnp.tile(lab, contrast_count)
        la = jnp.pad(anchor_lab, (0, m_pad - M)).reshape(m_pad, 1)
        lc = jnp.pad(contrast_lab, (0, n_pad - N)).reshape(1, n_pad)

        kernel = functools.partial(_supcon_labels_kernel, **common)
        in_specs = [a_spec, ct_spec,
                    pl.BlockSpec((tm, 1), lambda i, j: (i, 0)),
                    pl.BlockSpec((1, tn), lambda i, j: (0, j))]
        operands = (a, ct, la, lc)
        bytes_accessed = (a.size * isz + grid[0] * ct.size * isz
                          + la.size * 4 + grid[0] * lc.size * 4 + m_pad * 4)
    else:
        mask_f = jnp.asarray(mask).astype(jnp.float32)
        if mask_f.shape != (bsz, bsz):
            raise ValueError('`mask` must be [bsz, bsz]')
        # mask.repeat(ac, cc)[r, c] == mask[r % bsz, c % bsz]: stream the small
        # mask directly when the tiles divide bsz, otherwise materialize the
        # tiled mask in bf16 (half the f32 HBM traffic).
        if bsz % tm == 0 and bsz % tn == 0:
            nmb, nnb = bsz // tm, bsz // tn
            mask_op = mask_f.astype(jnp.bfloat16)
            mask_spec = pl.BlockSpec((tm, tn), lambda i, j: (i % nmb, j % nnb))
        else:
            full = jnp.tile(mask_f, (anchor_count, contrast_count))
            full = jnp.pad(full, ((0, m_pad - M), (0, n_pad - N)))
            mask_op = full.astype(jnp.bfloat16)
            mask_spec = pl.BlockSpec((tm, tn), lambda i, j: (i, j))

        kernel = functools.partial(_supcon_mask_kernel, **common)
        in_specs = [a_spec, ct_spec, mask_spec]
        operands = (a, ct, mask_op)
        bytes_accessed = (a.size * isz + grid[0] * ct.size * isz
                          + m_pad * n_pad * 2 + m_pad * 4)

    cost = pl.CostEstimate(
        flops=2 * m_pad * n_pad * d_pad,
        transcendentals=int(m_pad * n_pad + 2 * m_pad * grid[1]),
        bytes_accessed=int(bytes_accessed))

    out = pl.pallas_call(
        kernel,
        out_shape=out_shape,
        grid=grid,
        in_specs=in_specs,
        out_specs=out_spec,
        scratch_shapes=scratch,
        compiler_params=pltpu.CompilerParams(
            dimension_semantics=("parallel", "arbitrary"),
            vmem_limit_bytes=vmem_limit),
        cost_estimate=cost,
    )(*operands)

    # loss.view(anchor_count, batch_size).mean() == mean over the M anchors.
    loss_rows = out[:M, 0]
    return jnp.sum(loss_rows) / jnp.float32(M)


# ---------------------------------------------------------------------------
# Pure-JAX reference (mirrors the PyTorch module; same bf16 scaling scheme as
# the kernel so the comparison isolates kernel correctness).
# ---------------------------------------------------------------------------
def _supcon_loss_ref(features, labels=None, mask=None, *,
                     temperature=0.07, contrast_mode='all',
                     base_temperature=0.07, compute_dtype=jnp.bfloat16):
    features = features.reshape(features.shape[0], features.shape[1], -1)
    bsz, n_views, dim = features.shape
    if labels is None and mask is None:
        mask = jnp.eye(bsz, dtype=jnp.float32)
    elif labels is not None:
        labels = labels.reshape(-1, 1)
        mask = (labels == labels.T).astype(jnp.float32)
    else:
        mask = mask.astype(jnp.float32)
    contrast_count = n_views
    cf = jnp.transpose(features, (1, 0, 2)).reshape(n_views * bsz, dim)
    if contrast_mode == 'one':
        af, anchor_count = features[:, 0], 1
    else:
        af, anchor_count = cf, contrast_count
    a = (af * (1.0 / temperature)).astype(compute_dtype)
    c = cf.astype(compute_dtype)
    logits = jnp.dot(a, c.T, preferred_element_type=jnp.float32)
    logits = logits - jnp.max(logits, axis=1, keepdims=True)
    M = bsz * anchor_count
    full_mask = jnp.tile(mask, (anchor_count, contrast_count))
    lmask = jnp.ones_like(full_mask).at[jnp.arange(M), jnp.arange(M)].set(0.0)
    full_mask = full_mask * lmask
    exp_logits = jnp.exp(logits) * lmask
    log_prob = logits - jnp.log(exp_logits.sum(1, keepdims=True))
    mean_log_prob_pos = (full_mask * log_prob).sum(1) / full_mask.sum(1)
    loss = -(temperature / base_temperature) * mean_log_prob_pos
    return loss.mean()


if __name__ == "__main__":
    key = jax.random.PRNGKey(0)

    def unit_norm(x):
        return x / jnp.linalg.norm(x, axis=-1, keepdims=True)

    # --- tiny shapes: all modes / mask variants (single-tile grids) ----------
    k1, k2 = jax.random.split(key)
    feats = unit_norm(jax.random.normal(k1, (4, 2, 32), dtype=jnp.float32))
    labels = jnp.array([0, 1, 0, 1], dtype=jnp.int32)
    explicit_mask = (labels[:, None] == labels[None, :]).astype(jnp.float32)

    cases = [
        ("labels/all", feats, dict(labels=labels)),
        ("simclr/all", feats, dict()),
        ("mask/all", feats, dict(mask=explicit_mask)),
        ("labels/one", feats, dict(labels=labels, contrast_mode='one')),
    ]

    # --- multi-tile grid: exercises online accumulation, the diagonal-tile
    # skip, padded contrast columns and feature-dim padding --------------------
    featsL = unit_norm(jax.random.normal(k2, (96, 2, 72), dtype=jnp.float32))
    labelsL = jnp.arange(96, dtype=jnp.int32) % 7
    cases.append(("labels/all/multitile", featsL,
                  dict(labels=labelsL, block_m=64, block_n=128)))

    # --- explicit mask streamed from the small (bsz, bsz) array --------------
    k3 = jax.random.fold_in(key, 3)
    featsM = unit_norm(jax.random.normal(k3, (128, 2, 32), dtype=jnp.float32))
    labelsM = jnp.arange(128, dtype=jnp.int32) % 5
    maskM = (labelsM[:, None] == labelsM[None, :]).astype(jnp.float32)
    cases.append(("mask/all/stream", featsM,
                  dict(mask=maskM, block_m=128, block_n=128)))

    for name, f, kwargs in cases:
        got = jax.block_until_ready(supcon_loss(f, **kwargs))
        ref_kwargs = {k: v for k, v in kwargs.items()
                      if k in ("labels", "mask", "contrast_mode")}
        want = jax.block_until_ready(_supcon_loss_ref(f, **ref_kwargs))
        assert bool(jnp.isfinite(got)), (name, got)
        assert jnp.allclose(got, want, atol=2e-3, rtol=2e-3), (name, got, want)

    print("KERNEL_OK")
</pallas_src>

<mosaic_0001>
module attributes {stable_mosaic.version = 11 : i64} {
  func.func @_supcon_labels_kernel(%arg0: i32, %arg1: i32, %arg2: memref<8x128xbf16, #tpu.memory_space<vmem>>, %arg3: memref<128x128xbf16, #tpu.memory_space<vmem>>, %arg4: memref<8x1xi32, #tpu.memory_space<vmem>>, %arg5: memref<1x128xi32, #tpu.memory_space<vmem>>, %arg6: memref<8x1xf32, #tpu.memory_space<vmem>>, %arg7: memref<8x1xf32, #tpu.memory_space<vmem>>, %arg8: memref<8x1xf32, #tpu.memory_space<vmem>>, %arg9: memref<8x1xf32, #tpu.memory_space<vmem>>, %arg10: memref<8x1xf32, #tpu.memory_space<vmem>>) attributes {dimension_semantics = [#tpu.dimension_semantics<parallel>, #tpu.dimension_semantics<arbitrary>], iteration_bounds = array<i64: 1, 1>, scalar_prefetch = 0 : i64, scratch_operands = 4 : i64, tpu.core_type = #tpu.core_type<tc>, window_params = [{transform_indices = @transform_0, window_bounds = array<i64: 8, 128>}, {transform_indices = @transform_1, window_bounds = array<i64: 128, 128>}, {transform_indices = @transform_2, window_bounds = array<i64: 8, 1>}, {transform_indices = @transform_3, window_bounds = array<i64: 1, 128>}, {transform_indices = @transform_4, window_bounds = array<i64: 8, 1>}]} {
    %c0 = arith.constant 0 : index
    %c0_0 = arith.constant 0 : index
    %0 = vector.load %arg2[%c0, %c0_0] : memref<8x128xbf16, #tpu.memory_space<vmem>>, vector<8x128xbf16>
    %c0_1 = arith.constant 0 : index
    %c0_2 = arith.constant 0 : index
    %1 = vector.load %arg3[%c0_1, %c0_2] : memref<128x128xbf16, #tpu.memory_space<vmem>>, vector<128x128xbf16>
    %cst = arith.constant dense<0.000000e+00> : vector<8x128xf32>
    %2 = tpu.matmul %0, %1, %cst {dimension_numbers = #tpu.dot_dimension_numbers<[1], [0], [0], [1], [0, 0, 1, 1], [], []>} : vector<8x128xbf16>, vector<128x128xbf16>, vector<8x128xf32> -> vector<8x128xf32>
    %c0_3 = arith.constant 0 : index
    %c0_4 = arith.constant 0 : index
    %3 = vector.load %arg4[%c0_3, %c0_4] : memref<8x1xi32, #tpu.memory_space<vmem>>, vector<8x1xi32>
    %c0_5 = arith.constant 0 : index
    %c0_6 = arith.constant 0 : index
    %4 = vector.load %arg5[%c0_5, %c0_6] : memref<1x128xi32, #tpu.memory_space<vmem>>, vector<1x128xi32>
    %5 = vector.broadcast %3 : vector<8x1xi32> to vector<8x128xi32>
    %6 = vector.broadcast %4 : vector<1x128xi32> to vector<8x128xi32>
    %7 = arith.cmpi eq, %5, %6 : vector<8x128xi32>
    %c0_i32 = arith.constant 0 : i32
    %8 = arith.cmpi eq, %arg1, %c0_i32 : i32
    %9 = arith.extui %8 : i1 to i32
    %c0_i32_7 = arith.constant 0 : i32
    %10 = arith.cmpi ne, %9, %c0_i32_7 : i32
    scf.if %10 {
      %cst_23 = arith.constant 0xFF800000 : f32
      %38 = vector.broadcast %cst_23 : f32 to vector<8x1xf32>
      %c0_24 = arith.constant 0 : index
      %c0_25 = arith.constant 0 : index
      %39 = vector.load %arg7[%c0_24, %c0_25] : memref<8x1xf32, #tpu.memory_space<vmem>>, vector<8x1xf32>
      tpu.vector_store %arg7[%c0_24, %c0_25], %38 {strides = array<i32>} : memref<8x1xf32, #tpu.memory_space<vmem>>, vector<8x1xf32>,
      %cst_26 = arith.constant 0.000000e+00 : f32
      %40 = vector.broadcast %cst_26 : f32 to vector<8x1xf32>
      %c0_27 = arith.constant 0 : index
      %c0_28 = arith.constant 0 : index
      %41 = vector.load %arg8[%c0_27, %c0_28] : memref<8x1xf32, #tpu.memory_space<vmem>>, vector<8x1xf32>
      tpu.vector_store %arg8[%c0_27, %c0_28], %40 {strides = array<i32>} : memref<8x1xf32, #tpu.memory_space<vmem>>, vector<8x1xf32>,
      %cst_29 = arith.constant 0.000000e+00 : f32
      %42 = vector.broadcast %cst_29 : f32 to vector<8x1xf32>
      %c0_30 = arith.constant 0 : index
      %c0_31 = arith.constant 0 : index
      %43 = vector.load %arg9[%c0_30, %c0_31] : memref<8x1xf32, #tpu.memory_space<vmem>>, vector<8x1xf32>
      tpu.vector_store %arg9[%c0_30, %c0_31], %42 {strides = array<i32>} : memref<8x1xf32, #tpu.memory_space<vmem>>, vector<8x1xf32>,
      %cst_32 = arith.constant 0.000000e+00 : f32
      %44 = vector.broadcast %cst_32 : f32 to vector<8x1xf32>
      %c0_33 = arith.constant 0 : index
      %c0_34 = arith.constant 0 : index
      %45 = vector.load %arg10[%c0_33, %c0_34] : memref<8x1xf32, #tpu.memory_space<vmem>>, vector<8x1xf32>
      tpu.vector_store %arg10[%c0_33, %c0_34], %44 {strides = array<i32>} : memref<8x1xf32, #tpu.memory_space<vmem>>, vector<8x1xf32>,
    } else {
    }
    %c0_8 = arith.constant 0 : index
    %c0_9 = arith.constant 0 : index
    %11 = vector.load %arg7[%c0_8, %c0_9] : memref<8x1xf32, #tpu.memory_space<vmem>>, vector<8x1xf32>
    %cst_10 = arith.constant dense<0xFF800000> : vector<8xf32>
    %12 = vector.multi_reduction <maximumf>, %2, %cst_10 [1] : vector<8x128xf32> to vector<8xf32>
    %13 = vector.shape_cast %12 : vector<8xf32> to vector<8x1xf32>
    %14 = arith.maximumf %11, %13 : vector<8x1xf32>
    %15 = arith.subf %11, %14 : vector<8x1xf32>
    %16 = math.exp %15 : vector<8x1xf32>
    %c0_11 = arith.constant 0 : index
    %c0_12 = arith.constant 0 : index
    %17 = vector.load %arg7[%c0_11, %c0_12] : memref<8x1xf32, #tpu.memory_space<vmem>>, vector<8x1xf32>
    tpu.vector_store %arg7[%c0_11, %c0_12], %14 {strides = array<i32>} : memref<8x1xf32, #tpu.memory_space<vmem>>, vector<8x1xf32>,
    %c0_13 = arith.constant 0 : index
    %c0_14 = arith.constant 0 : index
    %18 = vector.load %arg8[%c0_13, %c0_14] : memref<8x1xf32, #tpu.memory_space<vmem>>, vector<8x1xf32>
    %c8_i32 = arith.constant 8 : i32
    %19 = arith.muli %arg0, %c8_i32 : i32
    %c1_i32 = arith.constant 1 : i32
    %20 = arith.addi %arg1, %c1_i32 : i32
    %c128_i32 = arith.constant 128 : i32
    %21 = arith.muli %20, %c128_i32 : i32
    %22 = arith.cmpi slt, %19, %21 : i32
    %c128_i32_15 = arith.constant 128 : i32
    %23 = arith.muli %arg1, %c128_i32_15 : i32
    %c1_i32_16 = arith.constant 1 : i32
    %24 = arith.addi %arg0, %c1_i32_16 : i32
    %c8_i32_17 = arith.constant 8 : i32
    %25 = arith.muli %24, %c8_i32_17 : i32
    %26 = arith.cmpi slt, %23, %25 : i32
    %27 = arith.andi %22, %26 : i1
    %c0_i32_18 = arith.constant 0 : i32
    %28 = arith.cmpi eq, %arg1, %c0_i32_18 : i32
    %29 = arith.ori %27, %28 : i1
    %30 = arith.extui %29 : i1 to i32
    %c0_i32_19 = arith.constant 0 : i32
    %31 = arith.cmpi ne, %30, %c0_i32_19 : i32
    scf.if %31 {
      %c8_i32_23 = arith.constant 8 : i32
      %38 = arith.muli %arg0, %c8_i32_23 : i32
      %39 = tpu.iota {dimensions = array<i32: 0>} : vector<8x1xi32>
      %40 = vector.broadcast %38 : i32 to vector<8x1xi32>
      %41 = arith.addi %40, %39 : vector<8x1xi32>
      %c128_i32_24 = arith.constant 128 : i32
      %42 = arith.muli %arg1, %c128_i32_24 : i32
      %43 = tpu.iota {dimensions = array<i32: 1>} : vector<1x128xi32>
      %44 = vector.broadcast %42 : i32 to vector<1x128xi32>
      %45 = arith.addi %44, %43 : vector<1x128xi32>
      %46 = vector.broadcast %41 : vector<8x1xi32> to vector<8x128xi32>
      %47 = vector.broadcast %45 : vector<1x128xi32> to vector<8x128xi32>
      %48 = arith.cmpi ne, %46, %47 : vector<8x128xi32>
      %c8_i32_25 = arith.constant 8 : i32
      %49 = vector.broadcast %c8_i32_25 : i32 to vector<1x128xi32>
      %50 = arith.cmpi slt, %45, %49 : vector<1x128xi32>
      %51 = vector.broadcast %50 : vector<1x128xi1> to vector<8x128xi1>
      %52 = arith.andi %48, %51 : vector<8x128xi1>
      %53 = arith.andi %7, %52 : vector<8x128xi1>
      %cst_26 = arith.constant -1.000000e+30 : f32
      %54 = vector.broadcast %cst_26 : f32 to vector<8x128xf32>
      %55 = arith.select %52, %2, %54 : vector<8x128xi1>, vector<8x128xf32>
      %cst_27 = arith.constant 0.000000e+00 : f32
      %56 = vector.broadcast %cst_27 : f32 to vector<8x128xf32>
      %57 = arith.select %53, %2, %56 : vector<8x128xi1>, vector<8x128xf32>
      %cst_28 = arith.constant dense<0.000000e+00> : vector<8xf32>
      %58 = vector.multi_reduction <add>, %57, %cst_28 [1] : vector<8x128xf32> to vector<8xf32>
      %59 = vector.shape_cast %58 : vector<8xf32> to vector<8x1xf32>
      %60 = arith.extui %53 : vector<8x128xi1> to vector<8x128xi32>
      %61 = arith.sitofp %60 : vector<8x128xi32> to vector<8x128xf32>
      %cst_29 = arith.constant dense<0.000000e+00> : vector<8xf32>
      %62 = vector.multi_reduction <add>, %61, %cst_29 [1] : vector<8x128xf32> to vector<8xf32>
      %63 = vector.shape_cast %62 : vector<8xf32> to vector<8x1xf32>
      %64 = vector.broadcast %14 : vector<8x1xf32> to vector<8x128xf32>
      %65 = arith.subf %55, %64 : vector<8x128xf32>
      %66 = math.exp %65 : vector<8x128xf32>
      %67 = arith.mulf %16, %18 : vector<8x1xf32>
      %cst_30 = arith.constant dense<0.000000e+00> : vector<8xf32>
      %68 = vector.multi_reduction <add>, %66, %cst_30 [1] : vector<8x128xf32> to vector<8xf32>
      %69 = vector.shape_cast %68 : vector<8xf32> to vector<8x1xf32>
      %70 = arith.addf %67, %69 : vector<8x1xf32>
      %c0_31 = arith.constant 0 : index
      %c0_32 = arith.constant 0 : index
      %71 = vector.load %arg8[%c0_31, %c0_32] : memref<8x1xf32, #tpu.memory_space<vmem>>, vector<8x1xf32>
      tpu.vector_store %arg8[%c0_31, %c0_32], %70 {strides = array<i32>} : memref<8x1xf32, #tpu.memory_space<vmem>>, vector<8x1xf32>,
      %c0_33 = arith.constant 0 : index
      %c0_34 = arith.constant 0 : index
      %72 = vector.load %arg9[%c0_33, %c0_34] : memref<8x1xf32, #tpu.memory_space<vmem>>, vector<8x1xf32>
      %73 = arith.addf %72, %59 : vector<8x1xf32>
      %c0_35 = arith.constant 0 : index
      %c0_36 = arith.constant 0 : index
      %74 = vector.load %arg9[%c0_35, %c0_36] : memref<8x1xf32, #tpu.memory_space<vmem>>, vector<8x1xf32>
      tpu.vector_store %arg9[%c0_35, %c0_36], %73 {strides = array<i32>} : memref<8x1xf32, #tpu.memory_space<vmem>>, vector<8x1xf32>,
      %c0_37 = arith.constant 0 : index
      %c0_38 = arith.constant 0 : index
      %75 = vector.load %arg10[%c0_37, %c0_38] : memref<8x1xf32, #tpu.memory_space<vmem>>, vector<8x1xf32>
      %76 = arith.addf %75, %63 : vector<8x1xf32>
      %c0_39 = arith.constant 0 : index
      %c0_40 = arith.constant 0 : index
      %77 = vector.load %arg10[%c0_39, %c0_40] : memref<8x1xf32, #tpu.memory_space<vmem>>, vector<8x1xf32>
      tpu.vector_store %arg10[%c0_39, %c0_40], %76 {strides = array<i32>} : memref<8x1xf32, #tpu.memory_space<vmem>>, vector<8x1xf32>,
    } else {
    }
    %true = arith.constant true
    %32 = arith.xori %29, %true : i1
    %33 = arith.extui %32 : i1 to i32
    %c0_i32_20 = arith.constant 0 : i32
    %34 = arith.cmpi ne, %33, %c0_i32_20 : i32
    scf.if %34 {
      %cst_23 = arith.constant 0.000000e+00 : f32
      %38 = vector.broadcast %cst_23 : f32 to vector<8x128xf32>
      %39 = arith.select %7, %2, %38 : vector<8x128xi1>, vector<8x128xf32>
      %cst_24 = arith.constant dense<0.000000e+00> : vector<8xf32>
      %40 = vector.multi_reduction <add>, %39, %cst_24 [1] : vector<8x128xf32> to vector<8xf32>
      %41 = vector.shape_cast %40 : vector<8xf32> to vector<8x1xf32>
      %42 = arith.extui %7 : vector<8x128xi1> to vector<8x128xi32>
      %43 = arith.sitofp %42 : vector<8x128xi32> to vector<8x128xf32>
      %cst_25 = arith.constant dense<0.000000e+00> : vector<8xf32>
      %44 = vector.multi_reduction <add>, %43, %cst_25 [1] : vector<8x128xf32> to vector<8xf32>
      %45 = vector.shape_cast %44 : vector<8xf32> to vector<8x1xf32>
      %46 = vector.broadcast %14 : vector<8x1xf32> to vector<8x128xf32>
      %47 = arith.subf %2, %46 : vector<8x128xf32>
      %48 = math.exp %47 : vector<8x128xf32>
      %49 = arith.mulf %16, %18 : vector<8x1xf32>
      %cst_26 = arith.constant dense<0.000000e+00> : vector<8xf32>
      %50 = vector.multi_reduction <add>, %48, %cst_26 [1] : vector<8x128xf32> to vector<8xf32>
      %51 = vector.shape_cast %50 : vector<8xf32> to vector<8x1xf32>
      %52 = arith.addf %49, %51 : vector<8x1xf32>
      %c0_27 = arith.constant 0 : index
      %c0_28 = arith.constant 0 : index
      %53 = vector.load %arg8[%c0_27, %c0_28] : memref<8x1xf32, #tpu.memory_space<vmem>>, vector<8x1xf32>
      tpu.vector_store %arg8[%c0_27, %c0_28], %52 {strides = array<i32>} : memref<8x1xf32, #tpu.memory_space<vmem>>, vector<8x1xf32>,
      %c0_29 = arith.constant 0 : index
      %c0_30 = arith.constant 0 : index
      %54 = vector.load %arg9[%c0_29, %c0_30] : memref<8x1xf32, #tpu.memory_space<vmem>>, vector<8x1xf32>
      %55 = arith.addf %54, %41 : vector<8x1xf32>
      %c0_31 = arith.constant 0 : index
      %c0_32 = arith.constant 0 : index
      %56 = vector.load %arg9[%c0_31, %c0_32] : memref<8x1xf32, #tpu.memory_space<vmem>>, vector<8x1xf32>
      tpu.vector_store %arg9[%c0_31, %c0_32], %55 {strides = array<i32>} : memref<8x1xf32, #tpu.memory_space<vmem>>, vector<8x1xf32>,
      %c0_33 = arith.constant 0 : index
      %c0_34 = arith.constant 0 : index
      %57 = vector.load %arg10[%c0_33, %c0_34] : memref<8x1xf32, #tpu.memory_space<vmem>>, vector<8x1xf32>
      %58 = arith.addf %57, %45 : vector<8x1xf32>
      %c0_35 = arith.constant 0 : index
      %c0_36 = arith.constant 0 : index
      %59 = vector.load %arg10[%c0_35, %c0_36] : memref<8x1xf32, #tpu.memory_space<vmem>>, vector<8x1xf32>
      tpu.vector_store %arg10[%c0_35, %c0_36], %58 {strides = array<i32>} : memref<8x1xf32, #tpu.memory_space<vmem>>, vector<8x1xf32>,
    } else {
    }
    %c0_i32_21 = arith.constant 0 : i32
    %35 = arith.cmpi eq, %arg1, %c0_i32_21 : i32
    %36 = arith.extui %35 : i1 to i32
    %c0_i32_22 = arith.constant 0 : i32
    %37 = arith.cmpi ne, %36, %c0_i32_22 : i32
    scf.if %37 {
      %c0_23 = arith.constant 0 : index
      %c0_24 = arith.constant 0 : index
      %38 = vector.load %arg10[%c0_23, %c0_24] : memref<8x1xf32, #tpu.memory_space<vmem>>, vector<8x1xf32>
      %c0_25 = arith.constant 0 : index
      %c0_26 = arith.constant 0 : index
      %39 = vector.load %arg7[%c0_25, %c0_26] : memref<8x1xf32, #tpu.memory_space<vmem>>, vector<8x1xf32>
      %c0_27 = arith.constant 0 : index
      %c0_28 = arith.constant 0 : index
      %40 = vector.load %arg8[%c0_27, %c0_28] : memref<8x1xf32, #tpu.memory_space<vmem>>, vector<8x1xf32>
      %41 = math.log %40 : vector<8x1xf32>
      %42 = arith.addf %39, %41 : vector<8x1xf32>
      %c0_29 = arith.constant 0 : index
      %c0_30 = arith.constant 0 : index
      %43 = vector.load %arg9[%c0_29, %c0_30] : memref<8x1xf32, #tpu.memory_space<vmem>>, vector<8x1xf32>
      %44 = arith.mulf %38, %42 : vector<8x1xf32>
      %45 = arith.subf %43, %44 : vector<8x1xf32>
      %46 = arith.divf %45, %38 : vector<8x1xf32>
      %cst_31 = arith.constant -1.000000e+00 : f32
      %47 = vector.broadcast %cst_31 : f32 to vector<8x1xf32>
      %48 = arith.mulf %47, %46 : vector<8x1xf32>
      %c0_32 = arith.constant 0 : index
      %c0_33 = arith.constant 0 : index
      %49 = vector.load %arg6[%c0_32, %c0_33] : memref<8x1xf32, #tpu.memory_space<vmem>>, vector<8x1xf32>
      tpu.vector_store %arg6[%c0_32, %c0_33], %48 {strides = array<i32>} : memref<8x1xf32, #tpu.memory_space<vmem>>, vector<8x1xf32>,
    } else {
    }
    return
  }
  func.func @transform_0(%arg0: i32, %arg1: i32) -> (i32, i32) {
    %c0_i32 = arith.constant 0 : i32
    %c0_i32_0 = arith.constant 0 : i32
    return %arg0, %c0_i32 : i32, i32
  }
  func.func @transform_1(%arg0: i32, %arg1: i32) -> (i32, i32) {
    %c0_i32 = arith.constant 0 : i32
    %c0_i32_0 = arith.constant 0 : i32
    return %c0_i32, %arg1 : i32, i32
  }
  func.func @transform_2(%arg0: i32, %arg1: i32) -> (i32, i32) {
    %c0_i32 = arith.constant 0 : i32
    %c0_i32_0 = arith.constant 0 : i32
    return %arg0, %c0_i32 : i32, i32
  }
  func.func @transform_3(%arg0: i32, %arg1: i32) -> (i32, i32) {
    %c0_i32 = arith.constant 0 : i32
    %c0_i32_0 = arith.constant 0 : i32
    return %c0_i32, %arg1 : i32, i32
  }
  func.func @transform_4(%arg0: i32, %arg1: i32) -> (i32, i32) {
    %c0_i32 = arith.constant 0 : i32
    %c0_i32_0 = arith.constant 0 : i32
    return %arg0, %c0_i32 : i32, i32
  }
}

</mosaic_0001>

<bundles_post_ra>
// kernel: tpu_custom_call.1
= control target key start
LH: loop header
LB: loop body
LE: loop exit
PB: predicated region body
PF: predicated region fallthrough
CT: control target
= control target key end

     0   :  { %9 = vsyncpa [#allocation7], 0  ;;  %s358_s15 = smov [#allocation6]   ;;  %s427_s0 = inlined_call_operand.vmem [shape: bf16[8,128], index: 0, kind: input, shape index: {}]   ;;  %s428_s1 = inlined_call_operand.hbm [shape: bf16[128,128], index: 1, kind: input, shape index: {}]   ;;  %s429_s2 = inlined_call_operand.vmem [shape: s32[8,1], index: 2, kind: input, shape index: {}]   ;;  %s430_s3 = inlined_call_operand.vmem [shape: s32[1,128], index: 3, kind: input, shape index: {}]   ;;  %s431_s4 = inlined_call_operand.vmem [shape: f32[8,1], index: 4, kind: output, shape index: {}]  }
   0x1   :  { %s17_s16 = sshll.u32 %s358_s15, 4  ;;  %s18_s16 = int_to_ptr.vmem [resolvable:$true] %s17_s16 }
   0x2   :  { %s344_s17 = scalar_lea.vmem %s18_s16, 1024  ;;  %p349_p1 = scmp.lt.s32.totalorder %s18_s16, %s18_s16 }
   0x3   :  { %p345_p0 = scmp.ne.s32.totalorder %s18_s16, %s344_s17  ;;  %p350_p2 = scmp.lt.s32.totalorder %s344_s17, %s344_s17 }
   0x5   :  { %p351_p3 = por %p350_p2, %p349_p1 }
   0x7   :  { %p352_p4 = pnand %p351_p3, %p345_p0 }
   0x9   :  { %355 = shalt.err (!%p352_p4)
}
   0xa   :  { %s359_s18 = smov 64   ;;  %s360_s19 = smov 4  }
   0xb   :  { %23 = dma.hbm_to_vmem [thread:$0]  %s428_s1, 1024, %s18_s16, [#allocation7], %s359_s18, %s359_s18, %s360_s19  }
   0xc   :  { %356 = dma.done.wait [#allocation7], 1024  }
   0xd   :  { %357 = vsyncadd [#allocation7], 4294966272  ;;  %v361_v0 = vmov 0.0   ;;  %vm362_vm0 = vmmov 0   ;;  %v363_v1 = vmov 0   ;;  %v320_v2 = vld [vmem:[#allocation6 + $0x38] sm:$0xff]   ;;  %v180_v21 = vlaneseq }
   0xe   :  { %291 = vmatprep.subr.bf16.mxu0 %v361_v0  ;;  %307 = vmatprep.mubr.msk.bf16.mxu0 %vm362_vm0, %v361_v0  ;;  %v321_v3 = vld [vmem:[#allocation6 + $0x30] sm:$0xff]   ;;  %v322_v4 = vld [vmem:[#allocation6 + $0x28] sm:$0xff]   ;;  %v137_v5 = vld [vmem:[%s429_s2] sm:$0xff]  ;;  %vm151_vm1 = vcmask 7168   ;;  %v364_v12 = vmov -inf  }
   0xf   :  { %319 = vset.pattern.permute.xlu1 %v363_v1  ;;  %318 = vset.pattern.permute.xlu0 %v363_v1  ;;  %v323_v6 = vld [vmem:[#allocation6 + $0x20] sm:$0xff]   ;;  %v324_v7 = vld [vmem:[#allocation6 + $0x18] sm:$0xff]   ;;  %v325_v8 = vld [vmem:[#allocation6 + $0x10] sm:$0xff]   ;;  %152 = vst.msk [vmem:[#allocation2] sm:$0xff] %vm151_vm1, %v364_v12  ;;  %v181_v22 = vshrl.u32 %v180_v21, 7  ;;  %v185_v23 = vand.u32 127, %v180_v21 }
  0x10   :  { %292 = vmatpush3.bf16.msra.mxu0 %v320_v2  ;;  %140 = vperm.xlu1 %319, %v137_v5   ;;  %v326_v9 = vld [vmem:[#allocation6 + $0x8] sm:$0xff]   ;;  %v327_v10 = vld [vmem:[#allocation6] sm:$0xff]   ;;  %153 = vst.msk [vmem:[#allocation3] sm:$0xff] %vm151_vm1, %v361_v0  ;;  %154 = vst.msk [vmem:[#allocation4] sm:$0xff] %vm151_vm1, %v361_v0 }
  0x11   :  { %293 = vmatprep.subr.bf16.mxu0 %v361_v0  ;;  %v32_v11 = vld [vmem:[%s427_s0] sm:$0xf]  ;;  %155 = vst.msk [vmem:[#allocation5] sm:$0xff] %vm151_vm1, %v361_v0  ;;  %vm188_vm2 = vcmp.ne.s32.totalorder %v181_v22, %v185_v23  ;;  %vm189_vm3 = vcmp.lt.s32.totalorder %v185_v23, 8 }
  0x12   :  { %vm192_vm4 = vmand %vm188_vm2, %vm189_vm3  ;;  %v279_v28 = vld [vmem:[%s430_s3] ss:$0 sm:$0xff] }
  0x14   :  { %294 = vmatpush3.bf16.msra.mxu0 %v321_v3 }
  0x15   :  { %295 = vmatprep.subr.bf16.mxu0 %v361_v0 }
  0x16   :  { %v156_v17 = vld [vmem:[#allocation2] sm:$0xff] }
  0x17   :  { %v165_v35 = vld [vmem:[#allocation3] sm:$0xff]  ;;  %v215_v42 = vld [vmem:[#allocation4] sm:$0xff] }
  0x18   :  { %296 = vmatpush3.bf16.msra.mxu0 %v322_v4  ;;  %v218_v39 = vld [vmem:[#allocation5] sm:$0xff] }
  0x19   :  { %297 = vmatprep.subr.bf16.mxu0 %v361_v0 }
  0x1c   :  { %298 = vmatpush3.bf16.msra.mxu0 %v323_v6 }
  0x1d   :  { %299 = vmatprep.subr.bf16.mxu0 %v361_v0 }
  0x20   :  { %300 = vmatpush3.bf16.msra.mxu0 %v324_v7 }
  0x21   :  { %301 = vmatprep.subr.bf16.mxu0 %v361_v0 }
  0x24   :  { %302 = vmatpush3.bf16.msra.mxu0 %v325_v8 }
  0x25   :  { %303 = vmatprep.subr.bf16.mxu0 %v361_v0 }
  0x28   :  { %304 = vmatpush3.bf16.msra.mxu0 %v326_v9 }
  0x29   :  { %305 = vmatprep.subr.bf16.mxu0 %v361_v0 }
  0x2c   :  { %306 = vmatpush3.bf16.msra.mxu0 %v327_v10 }
  0x2f   :  { %308 = vmatmul.mubr.bf16.vlgmr.msra.gmra.mxu0 %v32_v11 }
  0x8b   :  { %v141_v29 = vpop.permute.xlu1 %140 }
  0x8c   :  { %vm146_vm5 = vcmp.eq.s32.totalorder %v141_v29, %v279_v28 }
  0x8d   :  { %vm193_vm6 = vmand %vm146_vm5, %vm192_vm4 }
  0x8e   :  { %v280_v31 = vsel %vm193_vm6, 1.0, %v361_v0 }
  0xef   :  { %v131_v13 = vpop.f32.mrf.mxu0 }
  0xf0   :  { %157 = vmax.xlane.f32.xlu0 %v131_v13  ;;  %v194_v25 = vsel %vm192_vm4, %v131_v13, -1e+30  ;;  %v195_v32 = vsel %vm193_vm6, %v131_v13, 0.0 }
  0xf1   :  { %v309_v14 = vpop.f32.mrf.mxu0 }
  0xf3   :  { %v134_v15 = vpop.f32.mrf.mxu0 }
  0xf5   :  { %v310_v16 = vpop.f32.mrf.mxu0 }
 0x179   :  { %v158_v18 = vpop.xlane.xlu0 %157 }
 0x17a   :  { %v159_v19 = vmax.f32 %v156_v17, %v158_v18 }
 0x17c   :  { %v160_v20 = vsub.f32 %v156_v17, %v159_v19  ;;  %164 = vst.msk [vmem:[#allocation2] sm:$0xff] %vm151_vm1, %v159_v19  ;;  %204 = vperm.xlu0 %318, %v159_v19  }
 0x17e   :  { %v161_v33 = vmul.f32 1.442695, %v160_v20 }
 0x183   :  { %v254_v49 = vld [vmem:[#allocation2] sm:$0xff] }
 0x1f7   :  { %v205_v24 = vpop.permute.xlu0 %204 }
 0x1f8   :  { %v207_v26 = vsub.f32 %v194_v25, %v205_v24 }
 0x1fa   :  { %v208_v27 = vmul.f32 1.442695, %v207_v26 }
 0x1fc   :  { %328 = vpow2.f32 %v208_v27 }
 0x1fd   :  { %330 = vpow2.f32 %v161_v33 }
 0x209   :  { %v329_v30 = vpop.eup %328 }
 0x20a   :  { %211 = vadd.xlane.f32.xlu1 %v329_v30  ;;  %v331_v34 = vpop.eup %330 }
 0x20b   :  { %v210_v36 = vmul.f32 %v331_v34, %v165_v35 }
 0x20e   :  { %200 = vadd.xlane.f32.xlu1 %v280_v31 }
 0x212   :  { %196 = vadd.xlane.f32.xlu1 %v195_v32 }
 0x293   :  { %v212_v37 = vpop.xlane.xlu1 %211 }
 0x294   :  { %v213_v38 = vadd.f32 %v212_v37, %v210_v36 }
 0x296   :  { %214 = vst.msk [vmem:[#allocation3] sm:$0xff] %vm151_vm1, %v213_v38 }
 0x297   :  { %v201_v40 = vpop.xlane.xlu1 %200 }
 0x298   :  { %v219_v41 = vadd.f32 %v218_v39, %v201_v40 }
 0x29a   :  { %220 = vst.msk [vmem:[#allocation5] sm:$0xff] %vm151_vm1, %v219_v41 }
 0x29b   :  { %v197_v43 = vpop.xlane.xlu1 %196 }
 0x29c   :  { %v216_v44 = vadd.f32 %v215_v42, %v197_v43 }
 0x29d   :  { %v255_v45 = vld [vmem:[#allocation3] sm:$0xff] }
 0x29e   :  { %332 = vlog2.f32 %v255_v45  ;;  %217 = vst.msk [vmem:[#allocation4] sm:$0xff] %vm151_vm1, %v216_v44 }
 0x2a1   :  { %v253_v46 = vld [vmem:[#allocation5] sm:$0xff] }
 0x2a2   :  { %334 = vrcp.f32 %v253_v46 }
 0x2a5   :  { %v259_v53 = vld [vmem:[#allocation4] sm:$0xff] }
 0x2ab   :  { %v333_v47 = vpop.eup %332 }
 0x2ac   :  { %v257_v48 = vmul.f32 0.6931472, %v333_v47 }
 0x2ae   :  { %v258_v50 = vadd.f32 %v257_v48, %v254_v49 }
 0x2af   :  { %v335_v52 = vpop.eup %334 }
 0x2b0   :  { %v260_v51 = vmul.f32 %v258_v50, %v253_v46 }
 0x2b2   :  { %v261_v54 = vsub.f32 %v259_v53, %v260_v51 }
 0x2b4   :  { %v263_v55 = vmul.f32 %v335_v52, %v261_v54 }
 0x2b6   :  { %v264_v56 = vmul.f32 -1.0, %v263_v55 }
 0x2b8   :  { %265 = vst.msk [vmem:[%s431_s4] sm:$0xff] %vm151_vm1, %v264_v56 }
 0x2b9   :  { %270 = vsyncpa [#allocation7], 1 }

</bundles_post_ra>
